<compile_context>
chip_gen: v7x
topology: tpu7x:2x2x1
jax: 0.10.0
libtpu: 0.0.40
codegen_flags: <defaults>
</compile_context>

<pallas_src>
import math

import jax
import jax.numpy as jnp
import numpy as np
from jax import lax
from jax.experimental import pallas as pl
from jax.experimental.pallas import tpu as pltpu


# ---------------------------------------------------------------------------
# Fused kernel: LayerNorm -> QKV -> per-head attention -> residual -> MLP -> residual
# ---------------------------------------------------------------------------
def _make_block_kernel(*, batch_tile: int, seq_len: int, n_heads: int, eps: float):
    T = seq_len

    def kernel(x_ref, gamma_ref, beta_ref, wqkv_ref, bqkv_ref,
               w1_ref, b1_ref, w2_ref, b2_ref, o_ref, attn_ref):
        x = x_ref[...].astype(jnp.float32)                    # (R, E), R = batch_tile*T
        R, E = x.shape
        hs = E // n_heads
        scale = 1.0 / math.sqrt(hs)

        # ---- LayerNorm (biased variance, matches torch.nn.LayerNorm) ----
        mean = jnp.mean(x, axis=-1, keepdims=True)
        xc = x - mean
        var = jnp.mean(xc * xc, axis=-1, keepdims=True)
        y = xc * lax.rsqrt(var + eps)
        y = y * gamma_ref[...] + beta_ref[...]                 # (R, E)

        # ---- fused QKV projection; weights are pre-permuted to [Q | K | V] ----
        # (wrapper maps from the interleaved per-head layout implied by
        #  .view(bs, T, nh, 3*hs).transpose(1, 2) + torch.split(..., hs, dim=-1))
        qkv = jnp.dot(y.astype(wqkv_ref.dtype), wqkv_ref[...],
                      preferred_element_type=jnp.float32) + bqkv_ref[...]   # (R, 3E)

        # ---- per (batch element, head) attention; accumulate into VMEM scratch ----
        # TODO(synk): for long sequences tile T (flash-style online softmax) instead
        # of holding the full (R, 3E) QKV per grid step.
        for b in range(batch_tile):
            r0 = b * T
            for h in range(n_heads):
                c0 = h * hs
                q = qkv[r0:r0 + T, c0:c0 + hs]                 # (T, hs)
                k = qkv[r0:r0 + T, E + c0:E + c0 + hs]         # (T, hs)
                v = qkv[r0:r0 + T, 2 * E + c0:2 * E + c0 + hs]  # (T, hs)
                # s = q @ k.T without an explicit transpose (contract last dims).
                s = lax.dot_general(q, k, (((1,), (1,)), ((), ())),
                                    preferred_element_type=jnp.float32) * scale
                s = s - jnp.max(s, axis=-1, keepdims=True)
                p = jnp.exp(s)
                # Reciprocal goes to the EUP slot instead of a VALU divide.
                p = p * pl.reciprocal(jnp.sum(p, axis=-1, keepdims=True), approx=False)
                attn_ref[r0:r0 + T, c0:c0 + hs] = jnp.dot(
                    p, v, preferred_element_type=jnp.float32)

        out1 = x + attn_ref[...]                               # residual #1 (f32)

        # ---- MLP: Linear -> ReLU -> Linear, + residual #2 ----
        # TODO(synk): for mlp_dim too large to keep both weights resident
        # (esp. on v7x's 64 MiB VMEM), add a K-tiled reduction grid axis.
        h1 = jnp.dot(out1.astype(w1_ref.dtype), w1_ref[...],
                     preferred_element_type=jnp.float32) + b1_ref[...]
        h1 = jnp.maximum(h1, 0.0)
        out2 = jnp.dot(h1.astype(w2_ref.dtype), w2_ref[...],
                       preferred_element_type=jnp.float32) + b2_ref[...]

        # TODO(synk): E < 128 lowers to masked stores; for production shapes keep
        # the feature dim a lane multiple (or pack rows into a 128-lane slab).
        o_ref[...] = (out1 + out2).astype(o_ref.dtype)

    return kernel


# ---------------------------------------------------------------------------
# VMEM budgeting (generation-aware) and batch-tile selection.
# ---------------------------------------------------------------------------
def _vmem_budget_bytes() -> int:
    """~75% of physical VMEM per TensorCore (leaves compiler-scratch headroom)."""
    cap = 64 * 1024 * 1024  # conservative fallback (v7x per-TC VMEM)
    try:
        info = pltpu.get_tpu_info()
        cap_attr = getattr(info, "vmem_capacity_bytes", None)
        if cap_attr:
            cap = int(cap_attr)
    except Exception:
        pass
    return (3 * cap) // 4


def _resident_bytes(batch_tile: int, T: int, E: int, M: int, itemsize: int) -> int:
    """Rough per-grid-step VMEM footprint estimate."""
    R = batch_tile * T
    weights = (E * 3 * E + 3 * E + 2 * E + E * M + M + M * E + E) * itemsize
    io = 2 * 2 * R * E * itemsize              # double-buffered x / out tiles
    scratch = R * E * 4                        # attention accumulator (f32)
    temps = (R * 3 * E + 4 * R * E + 2 * R * M) * 4   # qkv + LN/residual + MLP hidden
    return 2 * weights + io + scratch + temps  # weights counted double-buffered


def _choose_batch_tile(bs: int, T: int, fits) -> int:
    """Pick how many batch elements each grid step processes: big enough to fill
    an MXU-sized LHS tile (>=128 rows) when possible, while keeping >=2 grid
    steps for DMA/compute pipelining and megacore sharding."""
    divisors = [d for d in range(1, bs + 1) if bs % d == 0]
    cands = [d for d in divisors if fits(d)] or [1]
    big = [d for d in cands if d * T >= 128]
    if big:
        return min(big)                        # smallest tile that fills the MXU
    multi = [d for d in cands if bs // d >= 2]
    return max(multi) if multi else max(cands)


# ---------------------------------------------------------------------------
# Wrapper.
# ---------------------------------------------------------------------------
def block_pallas(x, params, *, n_heads, eps=1e-5, batch_tile=None):
    """Full Block forward: out = out1 + MLP(out1), out1 = x + MHA(LN(x)).

    x: (bs, T, E).  Weights stored as (in_features, out_features), i.e. the
    transpose of nn.Linear.weight; fused QKV uses the interleaved per-head
    layout implied by `.view(bs, T, nh, 3*hs)` (q|k|v per head).
    """
    bs, T, E = x.shape
    assert E % n_heads == 0
    hs = E // n_heads
    M = params["w1"].shape[1]
    assert params["w2"].shape == (M, E), "residual add requires output_dim == E"
    itemsize = jnp.dtype(x.dtype).itemsize

    # Host-side one-time permutation of QKV columns: interleaved per-head
    # [q_h|k_h|v_h] -> [Q-heads | K-heads | V-heads], so kernel slices are
    # head-aligned views.  (TODO(synk): store weights in bf16 for production.)
    perm = np.concatenate([np.arange(h * 3 * hs + p * hs, h * 3 * hs + (p + 1) * hs)
                           for p in range(3) for h in range(n_heads)])
    wqkv = jnp.take(params["wqkv"], perm, axis=1)
    bqkv = jnp.take(params["bqkv"], perm, axis=0).reshape(1, 3 * E)
    gamma = params["ln_gamma"].reshape(1, E)
    beta = params["ln_beta"].reshape(1, E)
    b1 = params["b1"].reshape(1, M)
    b2 = params["b2"].reshape(1, E)

    budget = _vmem_budget_bytes()
    if batch_tile is None:
        batch_tile = _choose_batch_tile(
            bs, T, lambda bt: _resident_bytes(bt, T, E, M, itemsize) <= budget // 2)
    assert bs % batch_tile == 0
    # Row tile must be a sublane multiple (8 for f32) unless it is the full extent.
    if (batch_tile * T) % 8 != 0 and batch_tile != bs:
        batch_tile = bs
    R = batch_tile * T

    resident = _resident_bytes(batch_tile, T, E, M, itemsize)
    vmem_limit = int(min(budget, max(32 * 1024 * 1024, 2 * resident)))

    kernel = _make_block_kernel(batch_tile=batch_tile, seq_len=T,
                                n_heads=n_heads, eps=eps)

    x2d = x.reshape(bs * T, E)
    out2d = pl.pallas_call(
        kernel,
        out_shape=jax.ShapeDtypeStruct((bs * T, E), x.dtype),
        grid_spec=pltpu.PrefetchScalarGridSpec(
            num_scalar_prefetch=0,
            grid=(bs // batch_tile,),
            in_specs=[
                pl.BlockSpec((R, E), lambda i: (i, 0)),           # x rows
                pl.BlockSpec((1, E), lambda i: (0, 0)),           # ln gamma
                pl.BlockSpec((1, E), lambda i: (0, 0)),           # ln beta
                pl.BlockSpec((E, 3 * E), lambda i: (0, 0)),       # wqkv (permuted)
                pl.BlockSpec((1, 3 * E), lambda i: (0, 0)),       # bqkv (permuted)
                pl.BlockSpec((E, M), lambda i: (0, 0)),           # w1
                pl.BlockSpec((1, M), lambda i: (0, 0)),           # b1
                pl.BlockSpec((M, E), lambda i: (0, 0)),           # w2
                pl.BlockSpec((1, E), lambda i: (0, 0)),           # b2
            ],
            out_specs=pl.BlockSpec((R, E), lambda i: (i, 0)),
            scratch_shapes=[pltpu.VMEM((R, E), jnp.float32)],     # attn accumulator
        ),
        compiler_params=pltpu.CompilerParams(
            dimension_semantics=("parallel",),
            vmem_limit_bytes=vmem_limit),
    )(x2d, gamma, beta, wqkv, bqkv, params["w1"], b1, params["w2"], b2)

    return out2d.reshape(bs, T, E)


# ---------------------------------------------------------------------------
# Pure-JAX reference (mirrors the PyTorch module exactly).
# ---------------------------------------------------------------------------
def block_reference(x, params, *, n_heads, eps=1e-5):
    bs, T, E = x.shape
    hs = E // n_heads
    mean = jnp.mean(x, axis=-1, keepdims=True)
    var = jnp.mean((x - mean) ** 2, axis=-1, keepdims=True)
    y = (x - mean) / jnp.sqrt(var + eps) * params["ln_gamma"] + params["ln_beta"]
    qkv = y @ params["wqkv"] + params["bqkv"]                        # (bs, T, 3E)
    qkv = qkv.reshape(bs, T, n_heads, 3 * hs).transpose(0, 2, 1, 3)  # (bs, nh, T, 3hs)
    q, k, v = qkv[..., :hs], qkv[..., hs:2 * hs], qkv[..., 2 * hs:]
    s = (q @ jnp.swapaxes(k, -1, -2)) / np.sqrt(hs)
    p = jax.nn.softmax(s, axis=-1)
    a = (p @ v).transpose(0, 2, 1, 3).reshape(bs, T, E)
    out1 = x + a
    h = jnp.maximum(out1 @ params["w1"] + params["b1"], 0.0)
    return out1 + (h @ params["w2"] + params["b2"])


if __name__ == "__main__":
    # Small shapes consistent with Block(embedding_dim=32, mlp_dim=64, n_heads=4).
    bs, T, E, n_heads, mlp_dim = 2, 8, 32, 4, 64

    key = jax.random.PRNGKey(0)
    ks = jax.random.split(key, 10)
    x = jax.random.normal(ks[0], (bs, T, E), dtype=jnp.float32)

    lim_qkv = 1.0 / math.sqrt(E)
    lim1 = 1.0 / math.sqrt(E)
    lim2 = 1.0 / math.sqrt(mlp_dim)
    params = dict(
        ln_gamma=1.0 + 0.1 * jax.random.normal(ks[1], (E,), jnp.float32),
        ln_beta=0.1 * jax.random.normal(ks[2], (E,), jnp.float32),
        # Weights stored as (in_features, out_features) (transpose of nn.Linear.weight).
        wqkv=jax.random.uniform(ks[3], (E, 3 * E), jnp.float32, -lim_qkv, lim_qkv),
        bqkv=jax.random.uniform(ks[4], (3 * E,), jnp.float32, -lim_qkv, lim_qkv),
        w1=jax.random.uniform(ks[5], (E, mlp_dim), jnp.float32, -lim1, lim1),
        b1=jax.random.uniform(ks[6], (mlp_dim,), jnp.float32, -lim1, lim1),
        w2=jax.random.uniform(ks[7], (mlp_dim, E), jnp.float32, -lim2, lim2),
        b2=jax.random.uniform(ks[8], (E,), jnp.float32, -lim2, lim2),
    )

    out = block_pallas(x, params, n_heads=n_heads)
    out = jax.block_until_ready(out)

    ref = block_reference(x, params, n_heads=n_heads)
    assert out.shape == (bs, T, E)
    max_err = float(jnp.max(jnp.abs(out - ref)))
    assert max_err < 5e-4, f"mismatch vs reference: max abs err = {max_err}"

    print("KERNEL_OK")
</pallas_src>

<mosaic_0001>
module attributes {stable_mosaic.version = 11 : i64} {
  func.func @kernel(%arg0: i32, %arg1: memref<8x32xf32, #tpu.memory_space<vmem>>, %arg2: memref<1x32xf32, #tpu.memory_space<vmem>>, %arg3: memref<1x32xf32, #tpu.memory_space<vmem>>, %arg4: memref<32x96xf32, #tpu.memory_space<vmem>>, %arg5: memref<1x96xf32, #tpu.memory_space<vmem>>, %arg6: memref<32x64xf32, #tpu.memory_space<vmem>>, %arg7: memref<1x64xf32, #tpu.memory_space<vmem>>, %arg8: memref<64x32xf32, #tpu.memory_space<vmem>>, %arg9: memref<1x32xf32, #tpu.memory_space<vmem>>, %arg10: memref<8x32xf32, #tpu.memory_space<vmem>>, %arg11: memref<8x32xf32, #tpu.memory_space<vmem>>) attributes {dimension_semantics = [#tpu.dimension_semantics<parallel>], iteration_bounds = array<i64: 2>, scalar_prefetch = 0 : i64, scratch_operands = 1 : i64, tpu.core_type = #tpu.core_type<tc>, window_params = [{transform_indices = @transform_0, window_bounds = array<i64: 8, 32>}, {pipeline_mode = #tpu.pipeline_mode<synchronous>, transform_indices = @transform_1, window_bounds = array<i64: 1, 32>}, {pipeline_mode = #tpu.pipeline_mode<synchronous>, transform_indices = @transform_2, window_bounds = array<i64: 1, 32>}, {pipeline_mode = #tpu.pipeline_mode<synchronous>, transform_indices = @transform_3, window_bounds = array<i64: 32, 96>}, {pipeline_mode = #tpu.pipeline_mode<synchronous>, transform_indices = @transform_4, window_bounds = array<i64: 1, 96>}, {pipeline_mode = #tpu.pipeline_mode<synchronous>, transform_indices = @transform_5, window_bounds = array<i64: 32, 64>}, {pipeline_mode = #tpu.pipeline_mode<synchronous>, transform_indices = @transform_6, window_bounds = array<i64: 1, 64>}, {pipeline_mode = #tpu.pipeline_mode<synchronous>, transform_indices = @transform_7, window_bounds = array<i64: 64, 32>}, {pipeline_mode = #tpu.pipeline_mode<synchronous>, transform_indices = @transform_8, window_bounds = array<i64: 1, 32>}, {transform_indices = @transform_9, window_bounds = array<i64: 8, 32>}]} {
    %c0 = arith.constant 0 : index
    %c0_0 = arith.constant 0 : index
    %0 = vector.load %arg1[%c0, %c0_0] : memref<8x32xf32, #tpu.memory_space<vmem>>, vector<8x32xf32>
    %cst = arith.constant dense<0.000000e+00> : vector<8xf32>
    %1 = vector.multi_reduction <add>, %0, %cst [1] : vector<8x32xf32> to vector<8xf32>
    %2 = vector.shape_cast %1 : vector<8xf32> to vector<8x1xf32>
    %cst_1 = arith.constant 3.200000e+01 : f32
    %3 = vector.broadcast %cst_1 : f32 to vector<8x1xf32>
    %4 = arith.divf %2, %3 : vector<8x1xf32>
    %5 = vector.broadcast %4 : vector<8x1xf32> to vector<8x32xf32>
    %6 = arith.subf %0, %5 : vector<8x32xf32>
    %7 = arith.mulf %6, %6 : vector<8x32xf32>
    %cst_2 = arith.constant dense<0.000000e+00> : vector<8xf32>
    %8 = vector.multi_reduction <add>, %7, %cst_2 [1] : vector<8x32xf32> to vector<8xf32>
    %9 = vector.shape_cast %8 : vector<8xf32> to vector<8x1xf32>
    %cst_3 = arith.constant 3.200000e+01 : f32
    %10 = vector.broadcast %cst_3 : f32 to vector<8x1xf32>
    %11 = arith.divf %9, %10 : vector<8x1xf32>
    %cst_4 = arith.constant 9.99999974E-6 : f32
    %12 = vector.broadcast %cst_4 : f32 to vector<8x1xf32>
    %13 = arith.addf %11, %12 : vector<8x1xf32>
    %14 = math.rsqrt %13 : vector<8x1xf32>
    %15 = vector.broadcast %14 : vector<8x1xf32> to vector<8x32xf32>
    %16 = arith.mulf %6, %15 : vector<8x32xf32>
    %c0_5 = arith.constant 0 : index
    %c0_6 = arith.constant 0 : index
    %17 = vector.load %arg2[%c0_5, %c0_6] : memref<1x32xf32, #tpu.memory_space<vmem>>, vector<1x32xf32>
    %18 = vector.broadcast %17 : vector<1x32xf32> to vector<8x32xf32>
    %19 = arith.mulf %16, %18 : vector<8x32xf32>
    %c0_7 = arith.constant 0 : index
    %c0_8 = arith.constant 0 : index
    %20 = vector.load %arg3[%c0_7, %c0_8] : memref<1x32xf32, #tpu.memory_space<vmem>>, vector<1x32xf32>
    %21 = vector.broadcast %20 : vector<1x32xf32> to vector<8x32xf32>
    %22 = arith.addf %19, %21 : vector<8x32xf32>
    %c0_9 = arith.constant 0 : index
    %c0_10 = arith.constant 0 : index
    %23 = vector.load %arg4[%c0_9, %c0_10] : memref<32x96xf32, #tpu.memory_space<vmem>>, vector<32x96xf32>
    %cst_11 = arith.constant dense<0.000000e+00> : vector<8x96xf32>
    %24 = tpu.matmul %22, %23, %cst_11 {dimension_numbers = #tpu.dot_dimension_numbers<[1], [0], [0], [1], [0, 0, 1, 1], [], []>} : vector<8x32xf32>, vector<32x96xf32>, vector<8x96xf32> -> vector<8x96xf32>
    %c0_12 = arith.constant 0 : index
    %c0_13 = arith.constant 0 : index
    %25 = vector.load %arg5[%c0_12, %c0_13] : memref<1x96xf32, #tpu.memory_space<vmem>>, vector<1x96xf32>
    %26 = vector.broadcast %25 : vector<1x96xf32> to vector<8x96xf32>
    %27 = arith.addf %24, %26 : vector<8x96xf32>
    %28 = vector.extract_strided_slice %27 {offsets = [0, 0], sizes = [8, 8], strides = [1, 1]} : vector<8x96xf32> to vector<8x8xf32>
    %29 = vector.extract_strided_slice %27 {offsets = [0, 32], sizes = [8, 8], strides = [1, 1]} : vector<8x96xf32> to vector<8x8xf32>
    %30 = vector.extract_strided_slice %27 {offsets = [0, 64], sizes = [8, 8], strides = [1, 1]} : vector<8x96xf32> to vector<8x8xf32>
    %cst_14 = arith.constant dense<0.000000e+00> : vector<8x8xf32>
    %31 = tpu.matmul %28, %29, %cst_14 {dimension_numbers = #tpu.dot_dimension_numbers<[1], [1], [0], [0], [0, 0, 1, 0], [], []>} : vector<8x8xf32>, vector<8x8xf32>, vector<8x8xf32> -> vector<8x8xf32>
    %cst_15 = arith.constant 0.353553385 : f32
    %32 = vector.broadcast %cst_15 : f32 to vector<8x8xf32>
    %33 = arith.mulf %31, %32 : vector<8x8xf32>
    %cst_16 = arith.constant dense<0xFF800000> : vector<8xf32>
    %34 = vector.multi_reduction <maximumf>, %33, %cst_16 [1] : vector<8x8xf32> to vector<8xf32>
    %35 = vector.shape_cast %34 : vector<8xf32> to vector<8x1xf32>
    %36 = vector.broadcast %35 : vector<8x1xf32> to vector<8x8xf32>
    %37 = arith.subf %33, %36 : vector<8x8xf32>
    %38 = math.exp %37 : vector<8x8xf32>
    %cst_17 = arith.constant dense<0.000000e+00> : vector<8xf32>
    %39 = vector.multi_reduction <add>, %38, %cst_17 [1] : vector<8x8xf32> to vector<8xf32>
    %40 = vector.shape_cast %39 : vector<8xf32> to vector<8x1xf32>
    %41 = tpu.reciprocal %40 : vector<8x1xf32> -> vector<8x1xf32>
    %42 = vector.broadcast %41 : vector<8x1xf32> to vector<8x8xf32>
    %43 = arith.mulf %38, %42 : vector<8x8xf32>
    %cst_18 = arith.constant dense<0.000000e+00> : vector<8x8xf32>
    %44 = tpu.matmul %43, %30, %cst_18 {dimension_numbers = #tpu.dot_dimension_numbers<[1], [0], [0], [1], [0, 0, 1, 1], [], []>} : vector<8x8xf32>, vector<8x8xf32>, vector<8x8xf32> -> vector<8x8xf32>
    %c0_19 = arith.constant 0 : index
    %c0_20 = arith.constant 0 : index
    %45 = vector.load %arg11[%c0_19, %c0_20] : memref<8x32xf32, #tpu.memory_space<vmem>>, vector<8x8xf32>
    tpu.vector_store %arg11[%c0_19, %c0_20], %44 {strides = array<i32>} : memref<8x32xf32, #tpu.memory_space<vmem>>, vector<8x8xf32>,
    %46 = vector.extract_strided_slice %27 {offsets = [0, 8], sizes = [8, 8], strides = [1, 1]} : vector<8x96xf32> to vector<8x8xf32>
    %47 = vector.extract_strided_slice %27 {offsets = [0, 40], sizes = [8, 8], strides = [1, 1]} : vector<8x96xf32> to vector<8x8xf32>
    %48 = vector.extract_strided_slice %27 {offsets = [0, 72], sizes = [8, 8], strides = [1, 1]} : vector<8x96xf32> to vector<8x8xf32>
    %cst_21 = arith.constant dense<0.000000e+00> : vector<8x8xf32>
    %49 = tpu.matmul %46, %47, %cst_21 {dimension_numbers = #tpu.dot_dimension_numbers<[1], [1], [0], [0], [0, 0, 1, 0], [], []>} : vector<8x8xf32>, vector<8x8xf32>, vector<8x8xf32> -> vector<8x8xf32>
    %cst_22 = arith.constant 0.353553385 : f32
    %50 = vector.broadcast %cst_22 : f32 to vector<8x8xf32>
    %51 = arith.mulf %49, %50 : vector<8x8xf32>
    %cst_23 = arith.constant dense<0xFF800000> : vector<8xf32>
    %52 = vector.multi_reduction <maximumf>, %51, %cst_23 [1] : vector<8x8xf32> to vector<8xf32>
    %53 = vector.shape_cast %52 : vector<8xf32> to vector<8x1xf32>
    %54 = vector.broadcast %53 : vector<8x1xf32> to vector<8x8xf32>
    %55 = arith.subf %51, %54 : vector<8x8xf32>
    %56 = math.exp %55 : vector<8x8xf32>
    %cst_24 = arith.constant dense<0.000000e+00> : vector<8xf32>
    %57 = vector.multi_reduction <add>, %56, %cst_24 [1] : vector<8x8xf32> to vector<8xf32>
    %58 = vector.shape_cast %57 : vector<8xf32> to vector<8x1xf32>
    %59 = tpu.reciprocal %58 : vector<8x1xf32> -> vector<8x1xf32>
    %60 = vector.broadcast %59 : vector<8x1xf32> to vector<8x8xf32>
    %61 = arith.mulf %56, %60 : vector<8x8xf32>
    %cst_25 = arith.constant dense<0.000000e+00> : vector<8x8xf32>
    %62 = tpu.matmul %61, %48, %cst_25 {dimension_numbers = #tpu.dot_dimension_numbers<[1], [0], [0], [1], [0, 0, 1, 1], [], []>} : vector<8x8xf32>, vector<8x8xf32>, vector<8x8xf32> -> vector<8x8xf32>
    %c0_26 = arith.constant 0 : index
    %c8 = arith.constant 8 : index
    %63 = vector.load %arg11[%c0_26, %c8] : memref<8x32xf32, #tpu.memory_space<vmem>>, vector<8x8xf32>
    tpu.vector_store %arg11[%c0_26, %c8], %62 {strides = array<i32>} : memref<8x32xf32, #tpu.memory_space<vmem>>, vector<8x8xf32>,
    %64 = vector.extract_strided_slice %27 {offsets = [0, 16], sizes = [8, 8], strides = [1, 1]} : vector<8x96xf32> to vector<8x8xf32>
    %65 = vector.extract_strided_slice %27 {offsets = [0, 48], sizes = [8, 8], strides = [1, 1]} : vector<8x96xf32> to vector<8x8xf32>
    %66 = vector.extract_strided_slice %27 {offsets = [0, 80], sizes = [8, 8], strides = [1, 1]} : vector<8x96xf32> to vector<8x8xf32>
    %cst_27 = arith.constant dense<0.000000e+00> : vector<8x8xf32>
    %67 = tpu.matmul %64, %65, %cst_27 {dimension_numbers = #tpu.dot_dimension_numbers<[1], [1], [0], [0], [0, 0, 1, 0], [], []>} : vector<8x8xf32>, vector<8x8xf32>, vector<8x8xf32> -> vector<8x8xf32>
    %cst_28 = arith.constant 0.353553385 : f32
    %68 = vector.broadcast %cst_28 : f32 to vector<8x8xf32>
    %69 = arith.mulf %67, %68 : vector<8x8xf32>
    %cst_29 = arith.constant dense<0xFF800000> : vector<8xf32>
    %70 = vector.multi_reduction <maximumf>, %69, %cst_29 [1] : vector<8x8xf32> to vector<8xf32>
    %71 = vector.shape_cast %70 : vector<8xf32> to vector<8x1xf32>
    %72 = vector.broadcast %71 : vector<8x1xf32> to vector<8x8xf32>
    %73 = arith.subf %69, %72 : vector<8x8xf32>
    %74 = math.exp %73 : vector<8x8xf32>
    %cst_30 = arith.constant dense<0.000000e+00> : vector<8xf32>
    %75 = vector.multi_reduction <add>, %74, %cst_30 [1] : vector<8x8xf32> to vector<8xf32>
    %76 = vector.shape_cast %75 : vector<8xf32> to vector<8x1xf32>
    %77 = tpu.reciprocal %76 : vector<8x1xf32> -> vector<8x1xf32>
    %78 = vector.broadcast %77 : vector<8x1xf32> to vector<8x8xf32>
    %79 = arith.mulf %74, %78 : vector<8x8xf32>
    %cst_31 = arith.constant dense<0.000000e+00> : vector<8x8xf32>
    %80 = tpu.matmul %79, %66, %cst_31 {dimension_numbers = #tpu.dot_dimension_numbers<[1], [0], [0], [1], [0, 0, 1, 1], [], []>} : vector<8x8xf32>, vector<8x8xf32>, vector<8x8xf32> -> vector<8x8xf32>
    %c0_32 = arith.constant 0 : index
    %c16 = arith.constant 16 : index
    %81 = vector.load %arg11[%c0_32, %c16] : memref<8x32xf32, #tpu.memory_space<vmem>>, vector<8x8xf32>
    tpu.vector_store %arg11[%c0_32, %c16], %80 {strides = array<i32>} : memref<8x32xf32, #tpu.memory_space<vmem>>, vector<8x8xf32>,
    %82 = vector.extract_strided_slice %27 {offsets = [0, 24], sizes = [8, 8], strides = [1, 1]} : vector<8x96xf32> to vector<8x8xf32>
    %83 = vector.extract_strided_slice %27 {offsets = [0, 56], sizes = [8, 8], strides = [1, 1]} : vector<8x96xf32> to vector<8x8xf32>
    %84 = vector.extract_strided_slice %27 {offsets = [0, 88], sizes = [8, 8], strides = [1, 1]} : vector<8x96xf32> to vector<8x8xf32>
    %cst_33 = arith.constant dense<0.000000e+00> : vector<8x8xf32>
    %85 = tpu.matmul %82, %83, %cst_33 {dimension_numbers = #tpu.dot_dimension_numbers<[1], [1], [0], [0], [0, 0, 1, 0], [], []>} : vector<8x8xf32>, vector<8x8xf32>, vector<8x8xf32> -> vector<8x8xf32>
    %cst_34 = arith.constant 0.353553385 : f32
    %86 = vector.broadcast %cst_34 : f32 to vector<8x8xf32>
    %87 = arith.mulf %85, %86 : vector<8x8xf32>
    %cst_35 = arith.constant dense<0xFF800000> : vector<8xf32>
    %88 = vector.multi_reduction <maximumf>, %87, %cst_35 [1] : vector<8x8xf32> to vector<8xf32>
    %89 = vector.shape_cast %88 : vector<8xf32> to vector<8x1xf32>
    %90 = vector.broadcast %89 : vector<8x1xf32> to vector<8x8xf32>
    %91 = arith.subf %87, %90 : vector<8x8xf32>
    %92 = math.exp %91 : vector<8x8xf32>
    %cst_36 = arith.constant dense<0.000000e+00> : vector<8xf32>
    %93 = vector.multi_reduction <add>, %92, %cst_36 [1] : vector<8x8xf32> to vector<8xf32>
    %94 = vector.shape_cast %93 : vector<8xf32> to vector<8x1xf32>
    %95 = tpu.reciprocal %94 : vector<8x1xf32> -> vector<8x1xf32>
    %96 = vector.broadcast %95 : vector<8x1xf32> to vector<8x8xf32>
    %97 = arith.mulf %92, %96 : vector<8x8xf32>
    %cst_37 = arith.constant dense<0.000000e+00> : vector<8x8xf32>
    %98 = tpu.matmul %97, %84, %cst_37 {dimension_numbers = #tpu.dot_dimension_numbers<[1], [0], [0], [1], [0, 0, 1, 1], [], []>} : vector<8x8xf32>, vector<8x8xf32>, vector<8x8xf32> -> vector<8x8xf32>
    %c0_38 = arith.constant 0 : index
    %c24 = arith.constant 24 : index
    %99 = vector.load %arg11[%c0_38, %c24] : memref<8x32xf32, #tpu.memory_space<vmem>>, vector<8x8xf32>
    tpu.vector_store %arg11[%c0_38, %c24], %98 {strides = array<i32>} : memref<8x32xf32, #tpu.memory_space<vmem>>, vector<8x8xf32>,
    %c0_39 = arith.constant 0 : index
    %c0_40 = arith.constant 0 : index
    %100 = vector.load %arg11[%c0_39, %c0_40] : memref<8x32xf32, #tpu.memory_space<vmem>>, vector<8x32xf32>
    %101 = arith.addf %0, %100 : vector<8x32xf32>
    %c0_41 = arith.constant 0 : index
    %c0_42 = arith.constant 0 : index
    %102 = vector.load %arg6[%c0_41, %c0_42] : memref<32x64xf32, #tpu.memory_space<vmem>>, vector<32x64xf32>
    %cst_43 = arith.constant dense<0.000000e+00> : vector<8x64xf32>
    %103 = tpu.matmul %101, %102, %cst_43 {dimension_numbers = #tpu.dot_dimension_numbers<[1], [0], [0], [1], [0, 0, 1, 1], [], []>} : vector<8x32xf32>, vector<32x64xf32>, vector<8x64xf32> -> vector<8x64xf32>
    %c0_44 = arith.constant 0 : index
    %c0_45 = arith.constant 0 : index
    %104 = vector.load %arg7[%c0_44, %c0_45] : memref<1x64xf32, #tpu.memory_space<vmem>>, vector<1x64xf32>
    %105 = vector.broadcast %104 : vector<1x64xf32> to vector<8x64xf32>
    %106 = arith.addf %103, %105 : vector<8x64xf32>
    %cst_46 = arith.constant 0.000000e+00 : f32
    %107 = vector.broadcast %cst_46 : f32 to vector<8x64xf32>
    %108 = arith.maximumf %106, %107 : vector<8x64xf32>
    %c0_47 = arith.constant 0 : index
    %c0_48 = arith.constant 0 : index
    %109 = vector.load %arg8[%c0_47, %c0_48] : memref<64x32xf32, #tpu.memory_space<vmem>>, vector<64x32xf32>
    %cst_49 = arith.constant dense<0.000000e+00> : vector<8x32xf32>
    %110 = tpu.matmul %108, %109, %cst_49 {dimension_numbers = #tpu.dot_dimension_numbers<[1], [0], [0], [1], [0, 0, 1, 1], [], []>} : vector<8x64xf32>, vector<64x32xf32>, vector<8x32xf32> -> vector<8x32xf32>
    %c0_50 = arith.constant 0 : index
    %c0_51 = arith.constant 0 : index
    %111 = vector.load %arg9[%c0_50, %c0_51] : memref<1x32xf32, #tpu.memory_space<vmem>>, vector<1x32xf32>
    %112 = vector.broadcast %111 : vector<1x32xf32> to vector<8x32xf32>
    %113 = arith.addf %110, %112 : vector<8x32xf32>
    %114 = arith.addf %101, %113 : vector<8x32xf32>
    %c0_52 = arith.constant 0 : index
    %c0_53 = arith.constant 0 : index
    %115 = vector.load %arg10[%c0_52, %c0_53] : memref<8x32xf32, #tpu.memory_space<vmem>>, vector<8x32xf32>
    tpu.vector_store %arg10[%c0_52, %c0_53], %114 {strides = array<i32>} : memref<8x32xf32, #tpu.memory_space<vmem>>, vector<8x32xf32>,
    return
  }
  func.func @transform_0(%arg0: i32) -> (i32, i32) {
    %c0_i32 = arith.constant 0 : i32
    %c0_i32_0 = arith.constant 0 : i32
    return %arg0, %c0_i32 : i32, i32
  }
  func.func @transform_1(%arg0: i32) -> (i32, i32) {
    %c0_i32 = arith.constant 0 : i32
    %c0_i32_0 = arith.constant 0 : i32
    %c0_i32_1 = arith.constant 0 : i32
    return %c0_i32, %c0_i32_0 : i32, i32
  }
  func.func @transform_2(%arg0: i32) -> (i32, i32) {
    %c0_i32 = arith.constant 0 : i32
    %c0_i32_0 = arith.constant 0 : i32
    %c0_i32_1 = arith.constant 0 : i32
    return %c0_i32, %c0_i32_0 : i32, i32
  }
  func.func @transform_3(%arg0: i32) -> (i32, i32) {
    %c0_i32 = arith.constant 0 : i32
    %c0_i32_0 = arith.constant 0 : i32
    %c0_i32_1 = arith.constant 0 : i32
    return %c0_i32, %c0_i32_0 : i32, i32
  }
  func.func @transform_4(%arg0: i32) -> (i32, i32) {
    %c0_i32 = arith.constant 0 : i32
    %c0_i32_0 = arith.constant 0 : i32
    %c0_i32_1 = arith.constant 0 : i32
    return %c0_i32, %c0_i32_0 : i32, i32
  }
  func.func @transform_5(%arg0: i32) -> (i32, i32) {
    %c0_i32 = arith.constant 0 : i32
    %c0_i32_0 = arith.constant 0 : i32
    %c0_i32_1 = arith.constant 0 : i32
    return %c0_i32, %c0_i32_0 : i32, i32
  }
  func.func @transform_6(%arg0: i32) -> (i32, i32) {
    %c0_i32 = arith.constant 0 : i32
    %c0_i32_0 = arith.constant 0 : i32
    %c0_i32_1 = arith.constant 0 : i32
    return %c0_i32, %c0_i32_0 : i32, i32
  }
  func.func @transform_7(%arg0: i32) -> (i32, i32) {
    %c0_i32 = arith.constant 0 : i32
    %c0_i32_0 = arith.constant 0 : i32
    %c0_i32_1 = arith.constant 0 : i32
    return %c0_i32, %c0_i32_0 : i32, i32
  }
  func.func @transform_8(%arg0: i32) -> (i32, i32) {
    %c0_i32 = arith.constant 0 : i32
    %c0_i32_0 = arith.constant 0 : i32
    %c0_i32_1 = arith.constant 0 : i32
    return %c0_i32, %c0_i32_0 : i32, i32
  }
  func.func @transform_9(%arg0: i32) -> (i32, i32) {
    %c0_i32 = arith.constant 0 : i32
    %c0_i32_0 = arith.constant 0 : i32
    return %arg0, %c0_i32 : i32, i32
  }
}

</mosaic_0001>

<bundles_post_ra>
// kernel: tpu_custom_call.1
= control target key start
LH: loop header
LB: loop body
LE: loop exit
PB: predicated region body
PF: predicated region fallthrough
CT: control target
= control target key end

     0   :  { %14 = vsyncpa [#allocation4], 0  ;;  %s2000_s0 = inlined_call_operand.vmem [shape: f32[16,32], index: 0, kind: input, shape index: {}]   ;;  %s2001_s1 = inlined_call_operand.vmem [shape: f32[1,32], index: 1, kind: input, shape index: {}]   ;;  %s2002_s2 = inlined_call_operand.vmem [shape: f32[1,32], index: 2, kind: input, shape index: {}]   ;;  %s2003_s3 = inlined_call_operand.vmem [shape: f32[32,96], index: 3, kind: input, shape index: {}]   ;;  %s2004_s4 = inlined_call_operand.vmem [shape: f32[1,96], index: 4, kind: input, shape index: {}]   ;;  %s2005_s5 = inlined_call_operand.vmem [shape: f32[32,64], index: 5, kind: input, shape index: {}]   ;;  %s2006_s6 = inlined_call_operand.vmem [shape: f32[1,64], index: 6, kind: input, shape index: {}]   ;;  %s2007_s7 = inlined_call_operand.vmem [shape: f32[64,32], index: 7, kind: input, shape index: {}]   ;;  %s2008_s8 = inlined_call_operand.vmem [shape: f32[1,32], index: 8, kind: input, shape index: {}]   ;;  %s2009_s9 = inlined_call_operand.hbm [shape: f32[16,32], index: 9, kind: output, shape index: {}]  }
   0x1   :  { %16 = vsyncpa [#allocation4 + $0x1], 0  ;;  %s1754_s30 = smov 0   ;;  %s1756_s10 = smov 0  }
   0x2   :  { %s1758_s11 = smov 0   ;;  %s1760_s12 = smov 0  }
   0x3 LB: > { %s1775_s13 = sadd.s32 4294967295, %s1684_s12   ;;  %s1378_s14 = sadd.s32 4294967294, %s1684_s12   ;;  %s1684_s12 = sphi %s1760_s12, %s2015_s12   ;;  %s1680_s11 = sphi %s1758_s11, %s2014_s11   ;;  %s1676_s10 = sphi %s1756_s10, %s2013_s10   ;;  %s1672_s30 = sphi %s1754_s30, %s2012_s30  }
   0x4   : > { %s1779_s15 = sadd.s32 1, %s1684_s12   ;;  %s223_s16 = sadd.s32 1, %s1680_s11 }
   0x5   : > { %s220_s17 = ssub.s32 %s1684_s12, %s1779_s15  ;;  %p233_p0 = scmp.ne.s32.totalorder %s1680_s11, %s1676_s10 }
   0x6   : > { %p221_p1 = scmp.eq.s32.totalorder %s220_s17, 0  ;;  %p234_p2 = scmp.eq.s32.totalorder %s1775_s13, 1 }
   0x7   : > { %p239_p3 = scmp.ne.s32.totalorder %s1676_s10, %s1672_s30  ;;  %p240_p4 = scmp.eq.s32.totalorder %s1378_s14, 1 }
   0x8   : > { %s1790_s18 = scalar_select %p221_p1, %s1680_s11, %s223_s16  }
   0x9   : > { %p1792_p5 = por %p234_p2, %p233_p0  ;;  %p1796_p6 = por %p240_p4, %p239_p3 }
   0xa   : > { %p1381_p7 = scmp.ge.s32.totalorder %s1684_s12, 1  ;;  %p289_p8 = scmp.lt.s32.totalorder %s1684_s12, 3 }
   0xc   : > { %p290_p9 = pnand %p1381_p7, %p289_p8 }
   0xd   : > { %p324_p10 = scmp.lt.s32.totalorder (!%p290_p9), %s1775_s13, 1  ;;  %vm329_vm0 = vcmask (!%p290_p9), 261120   ;;  %v360_v7 = vld [vmem:[%s2003_s3] sm:$0xff] (!%p290_p9)  ;;  %v361_v8 = vld [vmem:[%s2003_s3 + $0x8] sm:$0xff] (!%p290_p9)  ;;  %v362_v9 = vld [vmem:[%s2003_s3 + $0x10] sm:$0xff] (!%p290_p9)  ;;  %v1686_v10 = vmov (!%p290_p9), 0.0|0.0  }
   0xe   : > { %293 = sbr.rel (%p290_p9) target bundleno = 1999 (0x7cf), region = 56  ;;  %1524 = vmatprep.subr.bf16.mxu0 (!%p290_p9), %v1686_v10  ;;  %v1525_v11 = vpack.c.bf16 (!%p290_p9), %v361_v8, %v360_v7  ;;  %v363_v12 = vld [vmem:[%s2003_s3 + $0x18] sm:$0xff] (!%p290_p9)  ;;  %vm1687_vm1 = vmmov (!%p290_p9), 0   ;;  %v1688_v13 = vmov (!%p290_p9), 0.0   ;;  %v1384_v19 = vld [vmem:[%s2001_s1] ss:$0 sm:$0xff] (!%p290_p9) }
   0xf   : > { %1451 = vmatprep.mubr.msk.f32.mxu0 (!%p290_p9), %vm1687_vm1, %v1688_v13  ;;  %1459 = vmatprep.subr.mxu1 (!%p290_p9), %v1688_v13  ;;  %v1528_v14 = vpack.c.bf16 (!%p290_p9), %v363_v12, %v362_v9  ;;  %v1385_v21 = vld [vmem:[%s2002_s2] ss:$0 sm:$0xff] (!%p290_p9)  ;;  %s1689_s28 = smov (!%p290_p9), 120   ;;  %s1690_s29 = smov (!%p290_p9), 96   ;;  %vm447_vm2 = vcmask (!%p290_p9), 64512   ;;  %vm781_vm3 = vcmask (!%p290_p9), 130112  }
  0x10   : > { %1461 = vmatprep.mubr.msk.f32.mxu1 (!%p290_p9), %vm1687_vm1, %v1688_v13  ;;  %1526 = vmatpush3.bf16.msra.mxu0 (!%p290_p9), %v1525_v11  ;;  %v1386_v24 = vld [vmem:[%s2004_s4] ss:$0 sm:$0xff] (!%p290_p9)  ;;  %s1691_s14 = smov (!%p290_p9), 88   ;;  %s1692_s16 = smov (!%p290_p9), 80   ;;  %vm953_vm4 = vcmask (!%p290_p9), 195712   ;;  %vm1125_vm5 = vcmask (!%p290_p9), 261312  }
  0x11   : > { %1527 = vmatprep.subr.bf16.mxu0 (!%p290_p9), %v1686_v10  ;;  %s1693_s17 = smov (!%p290_p9), 112   ;;  %s1696_s23 = smov (!%p290_p9), 64   ;;  %vm1229_vm6 = vcmask (!%p290_p9), 523264  }
  0x12   : > { %s1697_s24 = smov (!%p290_p9), 48   ;;  %s1699_s26 = smov (!%p290_p9), 56  }
  0x14   : > { %1529 = vmatpush3.bf16.msra.mxu0 (!%p290_p9), %v1528_v14 }
  0x15   : > { %s325_s21 = scalar_select %p324_p10, %s1775_s13, 1  ;;  %1454 = vmatprep.subr.mxu0 %v1688_v13 }
  0x17   : > { %s1383_s22 = sshll.u32 %s325_s21, 3  ;;  %s1694_s21 = smov 72  }
  0x18   : > { %s327_s25 = scalar_lea.vmem %s2000_s0, %s1383_s22  ;;  %s1695_s22 = smov 104  }
  0x19   : > { %v1807_v0 = vld [vmem:[%s327_s25] sm:$0xff]  ;;  %s1698_s25 = smov 40  }
  0x1a   : > { %v330_v1 = vsel %vm329_vm0, %v1807_v0, 0.0 }
  0x1b   : > { %331 = vadd.xlane.f32.xlu0 %v330_v1 }
  0xa8   : > { %v332_v2 = vpop.xlane.xlu0 %331 }
  0xa9   : > { %v334_v3 = vmul.f32 0.03125, %v332_v2 }
  0xab   : > { %v335_v4 = vsub.f32 %v1807_v0, %v334_v3 }
  0xad   : > { %v336_v5 = vmul.f32 %v335_v4, %v335_v4 }
  0xaf   : > { %v337_v6 = vsel %vm329_vm0, %v336_v5, 0.0 }
  0xb0   : > { %338 = vadd.xlane.f32.xlu0 %v337_v6 }
 0x13d   : > { %v339_v15 = vpop.xlane.xlu0 %338 }
 0x13e   : > { %v340_v16 = vmul.f32 0.03125, %v339_v15 }
 0x140   : > { %v341_v17 = vadd.f32 1e-05, %v340_v16 }
 0x142   : > { %1604 = vrsqrt.f32 %v341_v17 }
 0x14c   : > { %v1605_v18 = vpop.eup %1604 }
 0x14d   : > { %v343_v20 = vmul.f32 %v1605_v18, %v335_v4 }
 0x14f   : > { %v351_v22 = vmul.f32 %v1384_v19, %v343_v20 }
 0x151   : > { %v359_v23 = vadd.f32 %v1385_v21, %v351_v22 }
 0x153   : > { %1452 = vmatmul.mubr.msk.f32.vlgmr.msra.gmra.mrb[0].mxu0 %vm329_vm0, %v359_v23 }
 0x154   : > { %1456 = vmatprep.mubr.msk.f32.mxu0 %vm1687_vm1, %v1688_v13 }
 0x226   : > { %v440_v25 = vpop.f32.mrb[0].mxu0 }
 0x227   : > { %v1845_v26 = vadd.f32 %v1386_v24, %v440_v25  ;;  %v1453_v27 = vpop.f32.mrb[1].mxu0 }
 0x229   : > { %611 = vrot.lane.b32.xlu0 %v1845_v26, %s1689_s28  ;;  %445 = vrot.lane.b32.xlu1 %v1845_v26, %s1690_s29 }
 0x22d   : > { %613 = vrot.lane.b32.xlu1 %v1845_v26, %s1691_s14 }
 0x231   : > { %785 = vrot.lane.b32.xlu1 %v1845_v26, %s1692_s16 }
 0x235   : > { %783 = vrot.lane.b32.xlu1 %v1845_v26, %s1693_s17  ;;  %s321_s17 = sand.u32 1, %s1676_s10  }
 0x236   : > { %s1306_s14 = scalar_lea.sflag [#allocation4], %s321_s17 }
 0x239   : > { %957 = vrot.lane.b32.xlu1 %v1845_v26, %s1694_s21  ;;  %s1702_s21 = smov 24  }
 0x23d   : > { %955 = vrot.lane.b32.xlu1 %v1845_v26, %s1695_s22 }
 0x29b   : > { %v446_v28 = vpop.permute.xlu1 %445  ;;  %v612_v30 = vpop.permute.xlu0 %611 }
 0x29c   : > { %1455 = vmatpush3.xpose.msk.msra.mxu0 %vm447_vm2, %v446_v28  ;;  %v1129_v28 = vld [vmem:[%s2005_s5] sm:$0xff] }
 0x29d   : > { %1464 = vmatprep.subr.mxu0 %v1688_v13 }
 0x29f   : > { %1457 = vmatmul.mubr.msk.f32.vlgmr.msra.gmra.mrb[2].mxu0 %vm447_vm2, %v1845_v26  ;;  %v614_v29 = vpop.permute.xlu1 %613 }
 0x2a0   : > { %1465 = vmatpush3.xpose.msk.msra.mxu0 %vm447_vm2, %v614_v29  ;;  %1466 = vmatprep.mubr.msk.f32.mxu0 %vm1687_vm1, %v1688_v13  ;;  %v1130_v29 = vld [vmem:[%s2005_s5 + $0x8] sm:$0xff] }
 0x2a1   : > { %1474 = vmatprep.subr.mxu0 %v1688_v13 }
 0x2a3   : > { %1467 = vmatmul.mubr.msk.f32.vlgmr.msra.gmra.mrb[4].mxu0 %vm447_vm2, %v612_v30  ;;  %v786_v31 = vpop.permute.xlu1 %785  ;;  %v1131_v30 = vld [vmem:[%s2005_s5 + $0x10] sm:$0xff] }
 0x2a4   : > { %1475 = vmatpush3.xpose.msk.msra.mxu0 %vm447_vm2, %v786_v31  ;;  %1476 = vmatprep.mubr.msk.f32.mxu0 %vm1687_vm1, %v1688_v13  ;;  %v1531_v31 = vpack.c.bf16 %v1130_v29, %v1129_v28 }
 0x2a5   : > { %1484 = vmatprep.subr.mxu0 %v1688_v13 }
 0x2a7   : > { %v784_v32 = vpop.permute.xlu1 %783 }
 0x2a8   : > { %1477 = vmatmul.mubr.msk.f32.vlgmr.msra.gmra.mrb[6].mxu0 %vm447_vm2, %v784_v32 }
 0x2a9   : > { %1486 = vmatprep.mubr.msk.f32.mxu0 %vm1687_vm1, %v1688_v13 }
 0x2ab   : > { %v958_v33 = vpop.permute.xlu1 %957 }
 0x2ac   : > { %1485 = vmatpush3.xpose.msk.msra.mxu0 %vm447_vm2, %v958_v33 }
 0x2ad   : > { %1530 = vmatprep.subr.bf16.mxu0 %v1686_v10 }
 0x2af   : > { %v956_v34 = vpop.permute.xlu1 %955 }
 0x2b0   : > { %1487 = vmatmul.mubr.msk.f32.vlgmr.msra.gmra.mrb[8].mxu0 %vm447_vm2, %v956_v34 }
 0x2b1   : > { %1502 = vmatprep.mubr.msk.f32.mxu0 %vm1687_vm1, %v1688_v13  ;;  %1532 = vmatpush3.bf16.msra.mxu0 %v1531_v31 }
 0x2b2   : > { %1533 = vmatprep.subr.bf16.mxu0 %v1686_v10 }
 0x372   : > { %v518_v35 = vpop.f32.mrb[2].mxu0 }
 0x373   : > { %v522_v36 = vmul.f32 0.35355338, %v518_v35  ;;  %v1458_v37 = vpop.f32.mrb[3].mxu0 }
 0x374   : > { %v1214_v37 = vld [vmem:[%s2007_s7] sm:$0xff] }
 0x375   : > { %v523_v38 = vsel %vm447_vm2, %v522_v36, -inf }
 0x376   : > { %524 = vmax.xlane.f32.xlu1 %v523_v38  ;;  %v685_v39 = vpop.f32.mrb[4].mxu0  ;;  %v1215_v38 = vld [vmem:[%s2007_s7 + $0x8] sm:$0xff] }
 0x377   : > { %v689_v40 = vmul.f32 0.35355338, %v685_v39  ;;  %v1468_v41 = vpop.f32.mrb[5].mxu0  ;;  %v1216_v39 = vld [vmem:[%s2007_s7 + $0x10] sm:$0xff] }
 0x378   : > { %v1217_v41 = vld [vmem:[%s2007_s7 + $0x18] sm:$0xff] }
 0x379   : > { %v690_v42 = vsel %vm447_vm2, %v689_v40, -inf }
 0x37a   : > { %691 = vmax.xlane.f32.xlu0 %v690_v42 }
 0x37b   : > { %v857_v43 = vpop.f32.mrb[6].mxu0 }
 0x37c   : > { %v861_v44 = vmul.f32 0.35355338, %v857_v43  ;;  %v1478_v45 = vpop.f32.mrb[7].mxu0 }
 0x37d   : > { %v1218_v45 = vld [vmem:[%s2007_s7 + $0x20] sm:$0xff] }
 0x37e   : > { %v862_v46 = vsel %vm447_vm2, %v861_v44, -inf }
 0x37f   : > { %863 = vmax.xlane.f32.xlu1 %v862_v46  ;;  %v1219_v46 = vld [vmem:[%s2007_s7 + $0x28] sm:$0xff] }
 0x383   : > { %v1029_v47 = vpop.f32.mrb[8].mxu0 }
 0x384   : > { %v1033_v48 = vmul.f32 0.35355338, %v1029_v47  ;;  %v1488_v49 = vpop.f32.mrb[9].mxu0  ;;  %v1543_v47 = vpack.c.bf16 %v1219_v46, %v1218_v45 }
 0x386   : > { %v1034_v50 = vsel %vm447_vm2, %v1033_v48, -inf }
 0x387   : > { %1035 = vmax.xlane.f32.xlu0 %v1034_v50 }
 0x390   : > { %534 = vrot.lane.b32.xlu1 %v1845_v26, %s1696_s23  ;;  %s1700_s23 = smov 8  }
 0x403   : > { %v525_v51 = vpop.xlane.xlu1 %524 }
 0x404   : > { %v526_v52 = vsub.f32 %v522_v36, %v525_v51 }
 0x406   : > { %v527_v53 = vmul.f32 1.442695, %v526_v52 }
 0x407   : > { %v692_v54 = vpop.xlane.xlu0 %691 }
 0x408   : > { %1606 = vpow2.f32 %v527_v53  ;;  %v693_v55 = vsub.f32 %v689_v40, %v692_v54  ;;  %v1537_v40 = vpack.c.bf16 %v1215_v38, %v1214_v37  ;;  %v1221_v53 = vld [vmem:[%s2007_s7 + $0x38] sm:$0xff] }
 0x40a   : > { %v694_v56 = vmul.f32 1.442695, %v693_v55  ;;  %v1400_v55 = vld [vmem:[%s2006_s6] ss:$0 sm:$0xff] }
 0x40c   : > { %1608 = vpow2.f32 %v694_v56  ;;  %v864_v57 = vpop.xlane.xlu1 %863 }
 0x40d   : > { %v865_v58 = vsub.f32 %v861_v44, %v864_v57  ;;  %v1540_v44 = vpack.c.bf16 %v1217_v41, %v1216_v39 }
 0x40f   : > { %v866_v59 = vmul.f32 1.442695, %v865_v58 }
 0x410   : > { %v535_v60 = vpop.permute.xlu1 %534 }
 0x411   : > { %1610 = vpow2.f32 %v866_v59  ;;  %1460 = vmatpush3.msra.mxu1 %v535_v60  ;;  %v1402_v59 = vld [vmem:[%s2008_s8] ss:$0 sm:$0xff] }
 0x412   : > { %v1607_v61 = vpop.eup %1606  ;;  %1469 = vmatprep.subr.mxu1 %v1688_v13 }
 0x413   : > { %v529_v62 = vsel %vm447_vm2, %v1607_v61, 0.0 }
 0x414   : > { %530 = vadd.xlane.f32.xlu1 %v529_v62  ;;  %v1036_v63 = vpop.xlane.xlu0 %1035 }
 0x415   : > { %v1037_v1 = vsub.f32 %v1033_v48, %v1036_v63 }
 0x416   : > { %v1609_v2 = vpop.eup %1608 }
 0x417   : > { %v1038_v3 = vmul.f32 1.442695, %v1037_v1  ;;  %v696_v4 = vsel %vm447_vm2, %v1609_v2, 0.0 }
 0x418   : > { %697 = vadd.xlane.f32.xlu0 %v696_v4 }
 0x419   : > { %1612 = vpow2.f32 %v1038_v3 }
 0x41b   : > { %v1611_v5 = vpop.eup %1610 }
 0x41c   : > { %v868_v6 = vsel %vm447_vm2, %v1611_v5, 0.0 }
 0x41d   : > { %869 = vadd.xlane.f32.xlu1 %v868_v6 }
 0x423   : > { %v1613_v7 = vpop.eup %1612 }
 0x424   : > { %v1040_v8 = vsel %vm447_vm2, %v1613_v7, 0.0 }
 0x425   : > { %1041 = vadd.xlane.f32.xlu0 %v1040_v8 }
 0x42e   : > { %873 = vrot.lane.b32.xlu1 %v1845_v26, %s1697_s24  ;;  %s1701_s24 = smov 16  }
 0x432   : > { %1045 = vrot.lane.b32.xlu1 %v1845_v26, %s1698_s25 }
 0x43b   : > { %701 = vrot.lane.b32.xlu0 %v1845_v26, %s1699_s26 }
 0x4a1   : > { %v531_v9 = vpop.xlane.xlu1 %530 }
 0x4a2   : > { %1614 = vrcp.f32 %v531_v9 }
 0x4a5   : > { %v698_v11 = vpop.xlane.xlu0 %697 }
 0x4a6   : > { %1616 = vrcp.f32 %v698_v11 }
 0x4aa   : > { %v870_v12 = vpop.xlane.xlu1 %869 }
 0x4ab   : > { %1618 = vrcp.f32 %v870_v12 }
 0x4ac   : > { %v1615_v14 = vpop.eup %1614 }
 0x4ad   : > { %v533_v15 = vmul.f32 %v1615_v14, %v1607_v61 }
 0x4ae   : > { %v874_v19 = vpop.permute.xlu1 %873 }
 0x4af   : > { %1462 = vmatmul.mubr.msk.f32.vlgmr.msra.gmra.mrb[0].mxu1 %vm447_vm2, %v533_v15 }
 0x4b0   : > { %1471 = vmatprep.mubr.msk.f32.mxu1 %vm1687_vm1, %v1688_v13  ;;  %v1617_v17 = vpop.eup %1616 }
 0x4b1   : > { %v700_v18 = vmul.f32 %v1617_v17, %v1609_v2 }
 0x4b2   : > { %v1042_v16 = vpop.xlane.xlu0 %1041  ;;  %v1046_v23 = vpop.permute.xlu1 %1045 }
 0x4b3   : > { %1620 = vrcp.f32 %v1042_v16 }
 0x4b5   : > { %v1619_v21 = vpop.eup %1618 }
 0x4b6   : > { %v702_v20 = vpop.permute.xlu0 %701  ;;  %v872_v22 = vmul.f32 %v1619_v21, %v1611_v5 }
 0x4b7   : > { %1470 = vmatpush3.msra.mxu1 %v702_v20 }
 0x4b8   : > { %1472 = vmatmul.mubr.msk.f32.vlgmr.msra.gmra.mrb[2].mxu1 %vm447_vm2, %v700_v18  ;;  %1479 = vmatprep.subr.mxu1 %v1688_v13 }
 0x4b9   : > { %1480 = vmatpush3.msra.mxu1 %v874_v19  ;;  %1481 = vmatprep.mubr.msk.f32.mxu1 %vm1687_vm1, %v1688_v13 }
 0x4ba   : > { %1489 = vmatprep.subr.mxu1 %v1688_v13 }
 0x4bc   : > { %1482 = vmatmul.mubr.msk.f32.vlgmr.msra.gmra.mrb[4].mxu1 %vm447_vm2, %v872_v22 }
 0x4bd   : > { %v1621_v24 = vpop.eup %1620  ;;  %1490 = vmatpush3.msra.mxu1 %v1046_v23  ;;  %1491 = vmatprep.mubr.msk.f32.mxu1 %vm1687_vm1, %v1688_v13 }
 0x4be   : > { %v1044_v25 = vmul.f32 %v1621_v24, %v1613_v7  ;;  %1536 = vmatprep.subr.bf16.mxu1 %v1686_v10 }
 0x4c0   : > { %1492 = vmatmul.mubr.msk.f32.vlgmr.msra.gmra.mrb[6].mxu1 %vm447_vm2, %v1044_v25 }
 0x4c1   : > { %1521 = vmatprep.mubr.msk.f32.mxu1 %vm1687_vm1, %v1688_v13  ;;  %v1132_v13 = vld [vmem:[%s2005_s5 + $0x18] sm:$0xff]  ;;  %1538 = vmatpush3.bf16.msra.mxu1 %v1537_v40 }
 0x4c2   : > { %v1534_v32 = vpack.c.bf16 %v1132_v13, %v1131_v30  ;;  %1539 = vmatprep.subr.bf16.mxu1 %v1686_v10 }
 0x4c4   : > { %1535 = vmatpush3.bf16.msra.mxu0 %v1534_v32 }
 0x4c5   : > { %1541 = vmatpush3.bf16.msra.mxu1 %v1540_v44 }
 0x4c6   : > { %1542 = vmatprep.subr.bf16.mxu1 %v1686_v10 }
 0x4c9   : > { %1544 = vmatpush3.bf16.msra.mxu1 %v1543_v47 }
 0x4ca   : > { %1545 = vmatprep.subr.bf16.mxu1 %v1686_v10  ;;  %v1220_v10 = vld [vmem:[%s2007_s7 + $0x30] sm:$0xff] }
 0x4cb   : > { %v1546_v54 = vpack.c.bf16 %v1221_v53, %v1220_v10 }
 0x4cd   : > { %1547 = vmatpush3.bf16.msra.mxu1 %v1546_v54 }
 0x582   : > { %v606_v26 = vpop.f32.mrb[0].mxu1 }
 0x583   : > { %610 = vst.msk [vmem:[#allocation2] sm:$0xff] %vm447_vm2, %v606_v26  ;;  %v1463_v27 = vpop.f32.mrb[1].mxu1 }
 0x58b   : > { %v773_v33 = vpop.f32.mrb[2].mxu1 }
 0x58c   : > { %778 = vrot.lane.b32.xlu0 %v773_v33, %s1700_s23  ;;  %v1473_v34 = vpop.f32.mrb[3].mxu1 }
 0x58f   : > { %v945_v35 = vpop.f32.mrb[4].mxu1 }
 0x590   : > { %950 = vrot.lane.b32.xlu1 %v945_v35, %s1701_s24  ;;  %v1483_v36 = vpop.f32.mrb[5].mxu1  ;;  %s1405_s24 = sshll.u32 %s1775_s13, 7  ;;  %s1703_s13 = smov [#allocation3]  }
 0x591   : > { %s1957_s29 = scalar_lea.hbm %s2009_s9, %s1405_s24 }
 0x593   : > { %v1117_v42 = vpop.f32.mrb[6].mxu1 }
 0x594   : > { %1122 = vrot.lane.b32.xlu0 %v1117_v42, %s1702_s21  ;;  %v1493_v43 = vpop.f32.mrb[7].mxu1  ;;  %s1382_s21 = sshll.u32 %s321_s17, 3 }
 0x595   : > { %s323_s25 = scalar_lea.vmem [#allocation3], %s1382_s21  ;;  %s1626_s21 = sshll.u32 %s1703_s13, 4  ;;  %s1627_s21 = int_to_ptr.vmem [resolvable:$false] %s1626_s21 }
 0x596   : > { %s1319_s26 = sshll.u32 %s323_s25, 4  ;;  %s1628_s22 = scalar_lea.vmem %s1627_s21, 256  ;;  %s1959_s26 = int_to_ptr.vmem [resolvable:$true] %s1319_s26 }
 0x597   : > { %s1622_s16 = scalar_lea.vmem %s1959_s26, 128  ;;  %p1629_p0 = scmp.lt.s32.totalorder %s1959_s26, %s1627_s21 }
 0x598   : > { %p1623_p11 = scmp.ne.s32.totalorder %s1959_s26, %s1622_s16  ;;  %p1630_p1 = scmp.lt.s32.totalorder %s1628_s22, %s1622_s16 }
 0x59a   : > { %p1624_p12 = pnand %p1623_p11, %p1792_p5  ;;  %p1631_p2 = por %p1630_p1, %p1629_p0 }
 0x59c   : > { %p1625_p13 = pneg %p1624_p12 }
 0x59e   : > { %p1632_p3 = pnand %p1631_p2, %p1625_p13 }
 0x5fe   : > { %v779_v48 = vpop.permute.xlu0 %778 }
 0x5ff   : > { %782 = vst.msk [vmem:[#allocation2] sm:$0xff] %vm781_vm3, %v779_v48 }
 0x602   : > { %v951_v49 = vpop.permute.xlu1 %950 }
 0x603   : > { %954 = vst.msk [vmem:[#allocation2] sm:$0xff] %vm953_vm4, %v951_v49 }
 0x606   : > { %v1123_v50 = vpop.permute.xlu0 %1122 }
 0x607   : > { %1126 = vst.msk [vmem:[#allocation2] sm:$0xff] %vm1125_vm5, %v1123_v50 }
 0x60e   : > { %v1127_v51 = vld [vmem:[#allocation2] sm:$0xff] }
 0x60f   : > { %v1128_v52 = vadd.f32 %v1127_v51, %v1807_v0 }
 0x611   : > { %1503 = vmatmul.mubr.msk.f32.vlgmr.msra.gmra.mrb[10].mxu0 %vm329_vm0, %v1128_v52 }
 0x6e4   : > { %v1209_v56 = vpop.f32.mrb[10].mxu0 }
 0x6e5   : > { %v1210_v57 = vadd.f32 %v1400_v55, %v1209_v56  ;;  %v1504_v0 = vpop.f32.mrb[11].mxu0 }
 0x6e7   : > { %v1213_v58 = vmax.f32 %v1210_v57, 0.0 }
 0x6e9   : > { %1522 = vmatmul.mubr.msk.f32.vlgmr.msra.gmra.mrb[8].mxu1 %vm1229_vm6, %v1213_v58 }
 0x7bc   : > { %v1299_v60 = vpop.f32.mrb[8].mxu1 }
 0x7bd   : > { %v1300_v61 = vadd.f32 %v1402_v59, %v1299_v60  ;;  %v1523_v62 = vpop.f32.mrb[9].mxu1 }
 0x7bf   : > { %v1303_v63 = vadd.f32 %v1300_v61, %v1128_v52 }
 0x7c1   : > { %1304 = vst.msk [vmem:[%s323_s25] sm:$0xff] %vm329_vm0, %v1303_v63 }
 0x7c2   : > { %1635 = shalt.err (!%p1632_p3)
}
 0x7c3   : > { %s1636_s17 = scalar_lea.hbm %s1957_s29, 128  ;;  %s1640_s25 = scalar_lea.hbm %s2009_s9, 256 }
 0x7c4   : > { %p1637_p4 = scmp.ne.s32.totalorder %s1957_s29, %s1636_s17  ;;  %p1641_p9 = scmp.lt.u32.totalorder %s1957_s29, %s2009_s9 }
 0x7c5   : > { %p1642_p10 = scmp.lt.u32.totalorder %s1640_s25, %s1636_s17  ;;  %p1644_p12 = scmp.lt.u32.totalorder %s1636_s17, %s1957_s29 }
 0x7c6   : > { %p1638_p7 = pnand %p1637_p4, %p1792_p5 }
 0x7c7   : > { %p1643_p11 = por %p1642_p10, %p1641_p9 }
 0x7c8   : > { %p1639_p8 = pneg %p1638_p7 }
 0x7c9   : > { %p1645_p13 = por %p1644_p12, %p1643_p11 }
 0x7cb   : > { %p1646_p0 = pnand %p1645_p13, %p1639_p8 }
 0x7cd   : > { %1649 = shalt.err (!%p1646_p0)
}
 0x7ce   : > { %1548 = dma.vmem_to_hbm [thread:$0]  (%p1792_p5), %s1959_s26, 128, %s1957_s29, %s1306_s14  }
 0x7cf PF: > { %p1554_p1 = scmp.ge.s32.totalorder %s1684_s12, 2  ;;  %s1331_s16 = sand.u32 1, %s1672_s30  }
 0x7d0   : > { %s1332_s13 = scalar_lea.sflag [#allocation4], %s1331_s16 }
 0x7d1   : > { %p1551_p2 = pnand %p1554_p1, %p1796_p6 }
 0x7d3   : > { %1667 = dma.done.wait (!%p1551_p2), %s1332_s13, 128  }
 0x7d4   : > { %1669 = vsyncadd (!%p1551_p2), %s1332_s13, 4294967168  ;;  %p19_p3 = scmp.ge.s32.totalorder %s1779_s15, 4   ;;  %s2012_s30 = smov %s1676_s10 }
 0x7d5   : > { %s2013_s10 = smov %s1680_s11  ;;  %s2014_s11 = smov %s1790_s18 }
 0x7d6   : > { %s2015_s12 = smov %s1779_s15  ;;  %21 = sbr.rel (!%p19_p3) target bundleno = 3 (0x3), region = 91 }
 0x7dd   :  { %1337 = vsyncpa [#allocation4], 1 }
 0x7de   :  { %1339 = vsyncpa [#allocation4 + $0x1], 1 }

</bundles_post_ra>
